<compile_context>
chip_gen: v7x
topology: tpu7x:2x2x1
jax: 0.10.0
libtpu: 0.0.40
codegen_flags: <defaults>
</compile_context>

<pallas_src>
import functools

import jax
import jax.numpy as jnp
from jax.experimental import pallas as pl
from jax.experimental.pallas import tpu as pltpu


def _margin_loss_kernel(len_ref, tgt_ref, out_ref, acc_ref, *,
                        m_pos, m_neg, lambda_, batch, num_classes, k, tile_b,
                        size_average):
    i = pl.program_id(0)

    @pl.when(i == 0)
    def _init():
        acc_ref[...] = jnp.zeros_like(acc_ref)

    x = len_ref[...].astype(jnp.float32)          # (tb, K*C)
    tgt = tgt_ref[...]                            # (tb, 1) int32

    # K-mean from static lane slices (equivalent to .view(B, K, C).mean(dim=1)).
    c = num_classes
    s = x[:, 0:c]
    for kk in range(1, k):
        s = s + x[:, kk * c:(kk + 1) * c]
    mean_len = s * (1.0 / k)                      # (tb, C)

    tb = mean_len.shape[0]
    col = jax.lax.broadcasted_iota(jnp.int32, (tb, c), 1)
    is_target = col == tgt                        # one-hot(target) predicate

    pos = jnp.maximum(m_pos - mean_len, 0.0)      # relu(m_pos - L)
    neg = jnp.maximum(mean_len - m_neg, 0.0)      # relu(L - m_neg)
    losses = jnp.where(is_target, pos * pos, lambda_ * (neg * neg))

    # Zero out rows that only exist because of batch padding.
    row = jax.lax.broadcasted_iota(jnp.int32, (tb, c), 0) + i * tile_b
    losses = jnp.where(row < batch, losses, 0.0)

    # Steady state: elementwise VPU accumulate only (no per-step XLU reduce,
    # no per-step SMEM read-modify-write).
    acc_ref[...] += losses

    @pl.when(i == pl.num_programs(0) - 1)
    def _finalize():
        total = jnp.sum(acc_ref[...])
        if size_average:
            total = total * (1.0 / (batch * num_classes))
        out_ref[0, 0] = total


def margin_loss(lengths, targets, *, m_pos, m_neg, lambda_, num_classes,
                size_average=True, tile_b=2048):
    """Pallas TPU forward of MarginLoss. Returns a scalar float32 loss."""
    lengths = jnp.asarray(lengths)
    if lengths.dtype != jnp.bfloat16:             # keep bf16 as-is, upcast in-kernel
        lengths = lengths.astype(jnp.float32)
    targets = jnp.asarray(targets, jnp.int32)

    B = lengths.shape[0]
    flat = lengths.reshape(B, -1)                 # lane-dense 2D layout (B, K*C)
    N = flat.shape[1]
    if N % num_classes != 0:
        raise ValueError(
            f"lengths and targets have incompatible shapes: "
            f"{lengths.shape} vs ({B}, {num_classes})")
    K = N // num_classes
    tgt = targets.reshape(B, 1)

    # Batch tile: multiple of 8 (sublane), capped at tile_b and at padded B.
    tb = max(8, (int(tile_b) // 8) * 8)
    tb = min(tb, ((B + 7) // 8) * 8)
    B_pad = ((B + tb - 1) // tb) * tb
    if B_pad != B:
        flat = jnp.pad(flat, ((0, B_pad - B), (0, 0)))
        tgt = jnp.pad(tgt, ((0, B_pad - B), (0, 0)))

    kernel = functools.partial(
        _margin_loss_kernel,
        m_pos=float(m_pos), m_neg=float(m_neg), lambda_=float(lambda_),
        batch=B, num_classes=int(num_classes), k=int(K), tile_b=tb,
        size_average=bool(size_average))

    out = pl.pallas_call(
        kernel,
        out_shape=jax.ShapeDtypeStruct((1, 1), jnp.float32),
        grid=(B_pad // tb,),
        in_specs=[
            pl.BlockSpec((tb, N), lambda i: (i, 0)),
            pl.BlockSpec((tb, 1), lambda i: (i, 0)),
        ],
        out_specs=pl.BlockSpec(memory_space=pltpu.MemorySpace.SMEM),
        scratch_shapes=[pltpu.VMEM((tb, int(num_classes)), jnp.float32)],
        compiler_params=pltpu.CompilerParams(
            # Output/accumulator are resident across the batch grid axis.
            dimension_semantics=("arbitrary",),
            vmem_limit_bytes=32 * 1024 * 1024),
    )(flat, tgt)
    return out[0, 0]


def margin_loss_reference(lengths, targets, *, m_pos, m_neg, lambda_,
                          num_classes, size_average=True):
    """Pure-JAX reference of the PyTorch forward, for a sanity check."""
    B = lengths.shape[0]
    one_hot = jax.nn.one_hot(targets, num_classes, dtype=jnp.float32)
    L = lengths.reshape(B, -1, num_classes).mean(axis=1)
    losses = (one_hot * jnp.maximum(m_pos - L, 0.0) ** 2
              + lambda_ * (1.0 - one_hot) * jnp.maximum(L - m_neg, 0.0) ** 2)
    return losses.mean() if size_average else losses.sum()


if __name__ == "__main__":
    key = jax.random.PRNGKey(0)
    kl, kt = jax.random.split(key)

    B, K, NUM_CLASSES = 8, 4, 10
    M_POS, M_NEG, LAMBDA = 0.9, 0.1, 0.5

    lengths = jax.random.uniform(kl, (B, K * NUM_CLASSES), jnp.float32)
    targets = jax.random.randint(kt, (B,), 0, NUM_CLASSES, jnp.int32)

    for size_average in (True, False):
        out = margin_loss(lengths, targets, m_pos=M_POS, m_neg=M_NEG,
                          lambda_=LAMBDA, num_classes=NUM_CLASSES,
                          size_average=size_average)
        out = jax.block_until_ready(out)
        ref = margin_loss_reference(lengths, targets, m_pos=M_POS, m_neg=M_NEG,
                                    lambda_=LAMBDA, num_classes=NUM_CLASSES,
                                    size_average=size_average)
        assert out.shape == (), out.shape
        assert jnp.allclose(out, ref, atol=1e-5, rtol=1e-5), (
            float(out), float(ref))

    print("KERNEL_OK")
</pallas_src>

<mosaic_0001>
module attributes {stable_mosaic.version = 11 : i64} {
  func.func @_margin_loss_kernel(%arg0: i32, %arg1: memref<8x40xf32, #tpu.memory_space<vmem>>, %arg2: memref<8x1xi32, #tpu.memory_space<vmem>>, %arg3: memref<1x1xf32, #tpu.memory_space<smem>>, %arg4: memref<8x10xf32, #tpu.memory_space<vmem>>) attributes {dimension_semantics = [#tpu.dimension_semantics<arbitrary>], iteration_bounds = array<i64: 1>, scalar_prefetch = 0 : i64, scratch_operands = 1 : i64, tpu.core_type = #tpu.core_type<tc>, window_params = [{transform_indices = @transform_0, window_bounds = array<i64: 8, 40>}, {transform_indices = @transform_1, window_bounds = array<i64: 8, 1>}, {transform_indices = @transform_2, window_bounds = array<i64: 1, 1>}]} {
    %c0_i32 = arith.constant 0 : i32
    %0 = arith.cmpi eq, %arg0, %c0_i32 : i32
    %1 = arith.extui %0 : i1 to i32
    %c0_i32_0 = arith.constant 0 : i32
    %2 = arith.cmpi ne, %1, %c0_i32_0 : i32
    scf.if %2 {
      %cst_17 = arith.constant 0.000000e+00 : f32
      %44 = vector.broadcast %cst_17 : f32 to vector<8x10xf32>
      %c0_18 = arith.constant 0 : index
      %c0_19 = arith.constant 0 : index
      %45 = vector.load %arg4[%c0_18, %c0_19] : memref<8x10xf32, #tpu.memory_space<vmem>>, vector<8x10xf32>
      tpu.vector_store %arg4[%c0_18, %c0_19], %44 {strides = array<i32>} : memref<8x10xf32, #tpu.memory_space<vmem>>, vector<8x10xf32>,
    } else {
    }
    %c0 = arith.constant 0 : index
    %c0_1 = arith.constant 0 : index
    %3 = vector.load %arg1[%c0, %c0_1] : memref<8x40xf32, #tpu.memory_space<vmem>>, vector<8x40xf32>
    %c0_2 = arith.constant 0 : index
    %c0_3 = arith.constant 0 : index
    %4 = vector.load %arg2[%c0_2, %c0_3] : memref<8x1xi32, #tpu.memory_space<vmem>>, vector<8x1xi32>
    %5 = vector.extract_strided_slice %3 {offsets = [0, 0], sizes = [8, 10], strides = [1, 1]} : vector<8x40xf32> to vector<8x10xf32>
    %6 = vector.extract_strided_slice %3 {offsets = [0, 10], sizes = [8, 10], strides = [1, 1]} : vector<8x40xf32> to vector<8x10xf32>
    %7 = arith.addf %5, %6 : vector<8x10xf32>
    %8 = vector.extract_strided_slice %3 {offsets = [0, 20], sizes = [8, 10], strides = [1, 1]} : vector<8x40xf32> to vector<8x10xf32>
    %9 = arith.addf %7, %8 : vector<8x10xf32>
    %10 = vector.extract_strided_slice %3 {offsets = [0, 30], sizes = [8, 10], strides = [1, 1]} : vector<8x40xf32> to vector<8x10xf32>
    %11 = arith.addf %9, %10 : vector<8x10xf32>
    %cst = arith.constant 2.500000e-01 : f32
    %12 = vector.broadcast %cst : f32 to vector<8x10xf32>
    %13 = arith.mulf %11, %12 : vector<8x10xf32>
    %14 = tpu.iota {dimensions = array<i32: 1>} : vector<8x10xi32>
    %15 = vector.broadcast %4 : vector<8x1xi32> to vector<8x10xi32>
    %16 = arith.cmpi eq, %14, %15 : vector<8x10xi32>
    %cst_4 = arith.constant 0.899999976 : f32
    %17 = vector.broadcast %cst_4 : f32 to vector<8x10xf32>
    %18 = arith.subf %17, %13 : vector<8x10xf32>
    %cst_5 = arith.constant 0.000000e+00 : f32
    %19 = vector.broadcast %cst_5 : f32 to vector<8x10xf32>
    %20 = arith.maximumf %18, %19 : vector<8x10xf32>
    %cst_6 = arith.constant 1.000000e-01 : f32
    %21 = vector.broadcast %cst_6 : f32 to vector<8x10xf32>
    %22 = arith.subf %13, %21 : vector<8x10xf32>
    %cst_7 = arith.constant 0.000000e+00 : f32
    %23 = vector.broadcast %cst_7 : f32 to vector<8x10xf32>
    %24 = arith.maximumf %22, %23 : vector<8x10xf32>
    %25 = arith.mulf %20, %20 : vector<8x10xf32>
    %26 = arith.mulf %24, %24 : vector<8x10xf32>
    %cst_8 = arith.constant 5.000000e-01 : f32
    %27 = vector.broadcast %cst_8 : f32 to vector<8x10xf32>
    %28 = arith.mulf %27, %26 : vector<8x10xf32>
    %29 = arith.select %16, %25, %28 : vector<8x10xi1>, vector<8x10xf32>
    %30 = tpu.iota {dimensions = array<i32: 0>} : vector<8x10xi32>
    %c8_i32 = arith.constant 8 : i32
    %31 = arith.muli %arg0, %c8_i32 : i32
    %32 = vector.broadcast %31 : i32 to vector<8x10xi32>
    %33 = arith.addi %30, %32 : vector<8x10xi32>
    %c8_i32_9 = arith.constant 8 : i32
    %34 = vector.broadcast %c8_i32_9 : i32 to vector<8x10xi32>
    %35 = arith.cmpi slt, %33, %34 : vector<8x10xi32>
    %cst_10 = arith.constant 0.000000e+00 : f32
    %36 = vector.broadcast %cst_10 : f32 to vector<8x10xf32>
    %37 = arith.select %35, %29, %36 : vector<8x10xi1>, vector<8x10xf32>
    %c0_11 = arith.constant 0 : index
    %c0_12 = arith.constant 0 : index
    %38 = vector.load %arg4[%c0_11, %c0_12] : memref<8x10xf32, #tpu.memory_space<vmem>>, vector<8x10xf32>
    %39 = arith.addf %38, %37 : vector<8x10xf32>
    %c0_13 = arith.constant 0 : index
    %c0_14 = arith.constant 0 : index
    %40 = vector.load %arg4[%c0_13, %c0_14] : memref<8x10xf32, #tpu.memory_space<vmem>>, vector<8x10xf32>
    tpu.vector_store %arg4[%c0_13, %c0_14], %39 {strides = array<i32>} : memref<8x10xf32, #tpu.memory_space<vmem>>, vector<8x10xf32>,
    %c0_i32_15 = arith.constant 0 : i32
    %41 = arith.cmpi eq, %arg0, %c0_i32_15 : i32
    %42 = arith.extui %41 : i1 to i32
    %c0_i32_16 = arith.constant 0 : i32
    %43 = arith.cmpi ne, %42, %c0_i32_16 : i32
    scf.if %43 {
      %c0_17 = arith.constant 0 : index
      %c0_18 = arith.constant 0 : index
      %44 = vector.load %arg4[%c0_17, %c0_18] : memref<8x10xf32, #tpu.memory_space<vmem>>, vector<8x10xf32>
      %45 = vector.shape_cast %44 : vector<8x10xf32> to vector<1x8x10xf32>
      %cst_19 = arith.constant dense<0.000000e+00> : vector<1xf32>
      %46 = vector.multi_reduction <add>, %45, %cst_19 [1, 2] : vector<1x8x10xf32> to vector<1xf32>
      %47 = vector.shape_cast %46 : vector<1xf32> to vector<1x1x1xf32>
      %48 = vector.extract %47[0, 0, 0] : f32 from vector<1x1x1xf32>
      %cst_20 = arith.constant 1.250000e-02 : f32
      %49 = arith.mulf %48, %cst_20 : f32
      %c0_21 = arith.constant 0 : index
      %c0_22 = arith.constant 0 : index
      %50 = memref.load %arg3[%c0_21, %c0_22] : memref<1x1xf32, #tpu.memory_space<smem>>
      memref.store %49, %arg3[%c0_21, %c0_22] : memref<1x1xf32, #tpu.memory_space<smem>>
    } else {
    }
    return
  }
  func.func @transform_0(%arg0: i32) -> (i32, i32) {
    %c0_i32 = arith.constant 0 : i32
    %c0_i32_0 = arith.constant 0 : i32
    return %arg0, %c0_i32 : i32, i32
  }
  func.func @transform_1(%arg0: i32) -> (i32, i32) {
    %c0_i32 = arith.constant 0 : i32
    %c0_i32_0 = arith.constant 0 : i32
    return %arg0, %c0_i32 : i32, i32
  }
  func.func @transform_2(%arg0: i32) -> (i32, i32) {
    %c0_i32 = arith.constant 0 : i32
    %c0_i32_0 = arith.constant 0 : i32
    %c0_i32_1 = arith.constant 0 : i32
    return %c0_i32, %c0_i32_0 : i32, i32
  }
}

</mosaic_0001>

<bundles_post_ra>
// kernel: tpu_custom_call.1
= control target key start
LH: loop header
LB: loop body
LE: loop exit
PB: predicated region body
PF: predicated region fallthrough
CT: control target
= control target key end

     0   :  { %vm16_vm0 = vcmask 80896   ;;  %s112_s11 = smov 98   ;;  %s113_s12 = smov 118   ;;  %s154_s0 = inlined_call_operand.vmem [shape: f32[8,40], index: 0, kind: input, shape index: {}]   ;;  %s155_s1 = inlined_call_operand.vmem [shape: s32[8,1], index: 1, kind: input, shape index: {}]   ;;  %s156_s2 = inlined_call_operand.hbm [shape: f32[1,1], index: 2, kind: output, shape index: {}]  }
   0x1   :  { %v18_v0 = vld [vmem:[%s154_s0] sm:$0xff] }
   0x2   :  { %29 = vrot.lane.b32.xlu1 %v18_v0, %s112_s11  ;;  %21 = vrot.lane.b32.xlu0 %v18_v0, %s113_s12 }
   0x3   :  { %7 = vsyncpa [#allocation4], 0  ;;  %v114_v1 = vmov 0   ;;  %v19_v2 = vld [vmem:[%s155_s1] sm:$0xff]  ;;  %v115_v3 = vmov 0.0   ;;  %s116_s15 = smov 108   ;;  %v34_v11 = vlaneseq }
   0x4   :  { %98 = vset.pattern.permute.xlu1 %v114_v1  ;;  %17 = vst.msk [vmem:[#allocation2] sm:$0xff] %vm16_vm0, %v115_v3  ;;  %99 = vset.pattern.permute.xlu0 %v114_v1  ;;  %s100_s18 = scalar_lea.hbm %s156_s2, 16 }
   0x5   :  { %v35_v16 = vand.u32 127, %v34_v11  ;;  %p101_p0 = scmp.ne.s32.totalorder %s156_s2, %s100_s18  ;;  %p104_p1 = scmp.lt.u32.totalorder %s100_s18, %s156_s2 }
   0x6   :  { %37 = vperm.xlu1 %98, %v19_v2   ;;  %25 = vrot.lane.b32.xlu0 %v18_v0, %s116_s15 }
   0x7   :  { %p106_p2 = pnand %p104_p1, %p101_p0 }
   0xb   :  { %v55_v21 = vld [vmem:[#allocation2] sm:$0xff] }
  0x74   :  { %v22_v4 = vpop.permute.xlu0 %21  ;;  %v30_v8 = vpop.permute.xlu1 %29 }
  0x75   :  { %v24_v5 = vadd.f32 %v22_v4, %v18_v0 }
  0x78   :  { %v26_v6 = vpop.permute.xlu0 %25 }
  0x79   :  { %v28_v7 = vadd.f32 %v26_v6, %v24_v5 }
  0x7b   :  { %v32_v9 = vadd.f32 %v30_v8, %v28_v7 }
  0x7d   :  { %v33_v10 = vmul.f32 0.25, %v32_v9 }
  0x7f   :  { %v40_v12 = vsub.f32 0.9, %v33_v10  ;;  %v89_v13 = vadd.f32 -0.1, %v33_v10 }
  0x81   :  { %v41_v14 = vmax.f32 %v40_v12, 0.0  ;;  %v43_v15 = vmax.f32 %v89_v13, 0.0 }
  0x83   :  { %v45_v17 = vmul.f32 %v43_v15, %v43_v15  ;;  %v44_v18 = vmul.f32 %v41_v14, %v41_v14 }
  0x85   :  { %v46_v19 = vmul.f32 0.5, %v45_v17  ;;  %v38_v20 = vpop.permute.xlu1 %37 }
  0x86   :  { %vm39_vm1 = vcmp.eq.s32.totalorder %v35_v16, %v38_v20 }
  0x87   :  { %v47_v22 = vsel %vm39_vm1, %v44_v18, %v46_v19 }
  0x88   :  { %v56_v23 = vadd.f32 %v55_v21, %v47_v22 }
  0x8a   :  { %58 = vst.msk [vmem:[#allocation2] sm:$0xff] %vm16_vm0, %v56_v23 }
  0x91   :  { %v62_v24 = vld [vmem:[#allocation2] sm:$0xff] }
  0x92   :  { %v63_v25 = vsel %vm16_vm0, %v62_v24, 0.0 }
  0x93   :  { %64 = vadd.xlane.f32.xlu0 %v63_v25 }
 0x120   :  { %v65_v26 = vpop.xlane.xlu0 %64 }
 0x121   :  { %v66_v27 = vrot.slane %v65_v26, 4 }
 0x123   :  { %v67_v28 = vadd.f32 %v66_v27, %v65_v26 }
 0x125   :  { %v68_v29 = vrot.slane %v67_v28, 2 }
 0x127   :  { %v69_v30 = vadd.f32 %v68_v29, %v67_v28 }
 0x129   :  { %v70_v31 = vrot.slane %v69_v30, 1 }
 0x12b   :  { %v71_v32 = vadd.f32 %v70_v31, %v69_v30 }
 0x12d   :  { %90 = vpush %v71_v32 }
 0x15e   :  { %s91_s0 = spop %90 }
 0x15f   :  { %s73_s1 = smul.f32 0.0125, %s91_s0 }
 0x161   :  { %75 = sst [smem:[#allocation3]] %s73_s1 }
 0x162   :  { %109 = shalt.err (!%p106_p2)
}
 0x163   :  { %s117_s23 = smov [#allocation3]  }
 0x164   :  { %83 = dma.smem_to_hbm %s117_s23, 16, %s156_s2, [#allocation4]  }
 0x165   :  { %110 = dma.done.wait [#allocation4], 16  }
 0x166   :  { %111 = vsyncadd [#allocation4], 4294967280 }
 0x167   :  { %87 = sfence }
 0x168   :  { %88 = vsyncpa [#allocation4], 1 }

</bundles_post_ra>
